<compile_context>
chip_gen: v6e
topology: v6e:2x2x1
jax: 0.10.0
libtpu: 0.0.40
codegen_flags: <defaults>
</compile_context>

<pallas_src>
import math

import jax
import jax.numpy as jnp
from jax.experimental import pallas as pl
from jax.experimental.pallas import tpu as pltpu

POS_STEP = 0.001


# --------------------------------------------------------------------------
# Minimal JAX-side re-implementation of the dependent plumbing classes
# (no torch; only what Print.forward needs: register offsets/sizes).
# --------------------------------------------------------------------------
class Register:
    def __init__(self, name, size):
        self.name = name
        self.size = size
        self.offset = None


class EmbeddedState:
    def __init__(self, tokens, registers):
        self.tokens = tokens
        self.token_map = {t: i for i, t in enumerate(tokens)}
        self.registers = registers
        self.register_map = {}
        self.register_size = 0
        if len(registers) == 0 or registers[0].name != "pos":
            raise Exception("First register must be 'pos'")
        offset = len(tokens)
        for reg in registers:
            reg.offset = offset
            offset += reg.size
            self.register_size += reg.size
            self.register_map[reg.name] = reg
        self.dim = len(tokens) + self.register_size

    def tokenize(self, string):
        idx = jnp.array([self.token_map[c] for c in string], dtype=jnp.int32)
        return jax.nn.one_hot(idx, num_classes=len(self.tokens), dtype=jnp.float32)

    def embed(self, sequence, additional_constants):
        T = sequence.shape[0]
        ext = jnp.zeros((*sequence.shape[:-1], self.register_size), dtype=sequence.dtype)
        pos = jnp.arange(T, dtype=jnp.float32)
        ext = ext.at[:, 0].set(jnp.sin(pos * (2.0 * math.pi) * POS_STEP))
        ext = ext.at[:, 1].set(jnp.cos(pos * (2.0 * math.pi) * POS_STEP))
        offset = 2
        for constant in additional_constants:
            w = constant.shape[-1]
            ext = ext.at[:, offset:offset + w].set(constant)
            offset += w
        return jnp.concatenate((sequence, ext), axis=-1)


# --------------------------------------------------------------------------
# Pallas kernel: identity pass-through of seq (B, T, D).
# --------------------------------------------------------------------------
_LANES = 128            # vreg lane width
_MAX_BLOCK_ROWS = 2048  # 2048 x 128 x 4B = 1 MiB/buffer; multiple of 16 (f32 & bf16 tiles)


def _copy_kernel(x_ref, o_ref):
    o_ref[...] = x_ref[...]


def _identity_pallas(seq):
    """Identity pass-through implemented as an aliased, lane-dense Pallas copy."""
    B, T, D = seq.shape
    N = B * T * D
    flat = seq.reshape(-1)  # metadata-only reshape of a contiguous array

    if N % _LANES == 0:
        # Lane-dense path: view the whole tensor as (rows, 128) so every store
        # is a full-width vst, and tile rows into large VMEM-friendly blocks.
        rows = N // _LANES
        x2 = flat.reshape(rows, _LANES)
        if rows <= _MAX_BLOCK_ROWS:
            blk_rows = rows            # full-extent block: always layout-legal
        else:
            blk_rows = _MAX_BLOCK_ROWS  # multiple of 8/16; trailing block masked
        grid = (pl.cdiv(rows, blk_rows),)

        out2 = pl.pallas_call(
            _copy_kernel,
            out_shape=jax.ShapeDtypeStruct((rows, _LANES), seq.dtype),
            grid=grid,
            in_specs=[pl.BlockSpec((blk_rows, _LANES), lambda i: (i, 0))],
            out_specs=pl.BlockSpec((blk_rows, _LANES), lambda i: (i, 0)),
            input_output_aliases={0: 0},  # alias output to input HBM buffer (P8)
            compiler_params=pltpu.CompilerParams(
                dimension_semantics=("parallel",),
            ),
        )(x2)
        return out2.reshape(B, T, D)

    # Fallback (total size not a multiple of 128): per-batch full-extent slabs.
    # Block last two dims equal the full array dims, so the layout is legal.
    return pl.pallas_call(
        _copy_kernel,
        out_shape=jax.ShapeDtypeStruct((B, T, D), seq.dtype),
        grid=(B,),
        in_specs=[pl.BlockSpec((1, T, D), lambda b: (b, 0, 0))],
        out_specs=pl.BlockSpec((1, T, D), lambda b: (b, 0, 0)),
        input_output_aliases={0: 0},
        compiler_params=pltpu.CompilerParams(
            dimension_semantics=("parallel",),
        ),
    )(seq)


class PrintPallas:
    """JAX/Pallas equivalent of the PyTorch `Print` module."""

    def __init__(self, embedding: EmbeddedState, register: Register):
        self.embedding = embedding
        self.register = register

    def __call__(self, seq):
        out = _identity_pallas(seq)
        # Side effect: print int-cast flattened register slice of batch 0,
        # mirroring the PyTorch forward. Only the tiny slice is pulled to host.
        # TODO(synk): pl.debug_print only emits under interpret mode /
        # log-recorder, so the user-visible print stays host-side.
        sl = out[0, :, self.register.offset:self.register.offset + self.register.size]
        flat = jax.device_get(sl).flatten()
        print("".join(str(int(q)) for q in flat))
        return out


# --------------------------------------------------------------------------
# Example / smoke test
# --------------------------------------------------------------------------
if __name__ == "__main__":
    # Small deterministic setup: 4 tokens, 'pos' register (size 2),
    # 'val' register (size 2)  ->  dim = 4 + 2 + 2 = 8.
    tokens = ["a", "b", "0", "1"]
    pos_reg = Register("pos", 2)
    val_reg = Register("val", 2)
    emb = EmbeddedState(tokens, [pos_reg, val_reg])

    B, T = 2, 8
    key = jax.random.PRNGKey(0)
    seq = jax.random.normal(key, (B, T, emb.dim), dtype=jnp.float32)

    module = PrintPallas(emb, val_reg)
    out = module(seq)
    out = jax.block_until_ready(out)

    # Correctness: forward is an identity pass-through.
    assert out.shape == seq.shape and out.dtype == seq.dtype
    assert bool(jnp.all(out == seq))

    # Also exercise the tiled lane-dense path with a larger shape (rows > block).
    big = jax.random.normal(jax.random.PRNGKey(1), (4, 1024, 256), dtype=jnp.float32)
    big_out = jax.block_until_ready(_identity_pallas(big))
    assert bool(jnp.all(big_out == big))

    print("KERNEL_OK")
</pallas_src>

<mosaic_0001>
module attributes {stable_mosaic.version = 11 : i64} {
  func.func @_copy_kernel(%arg0: i32, %arg1: memref<1x128xf32, #tpu.memory_space<vmem>>, %arg2: memref<1x128xf32, #tpu.memory_space<vmem>>) attributes {dimension_semantics = [#tpu.dimension_semantics<parallel>], iteration_bounds = array<i64: 1>, scalar_prefetch = 0 : i64, scratch_operands = 0 : i64, tpu.core_type = #tpu.core_type<tc>, window_params = [{transform_indices = @transform_0, window_bounds = array<i64: 1, 128>}, {transform_indices = @transform_1, window_bounds = array<i64: 1, 128>}]} {
    %c0 = arith.constant 0 : index
    %c0_0 = arith.constant 0 : index
    %0 = vector.load %arg1[%c0, %c0_0] : memref<1x128xf32, #tpu.memory_space<vmem>>, vector<1x128xf32>
    %c0_1 = arith.constant 0 : index
    %c0_2 = arith.constant 0 : index
    %1 = vector.load %arg2[%c0_1, %c0_2] : memref<1x128xf32, #tpu.memory_space<vmem>>, vector<1x128xf32>
    tpu.vector_store %arg2[%c0_1, %c0_2], %0 {strides = array<i32>} : memref<1x128xf32, #tpu.memory_space<vmem>>, vector<1x128xf32>,
    return
  }
  func.func @transform_0(%arg0: i32) -> (i32, i32) {
    %c0_i32 = arith.constant 0 : i32
    %c0_i32_0 = arith.constant 0 : i32
    return %arg0, %c0_i32 : i32, i32
  }
  func.func @transform_1(%arg0: i32) -> (i32, i32) {
    %c0_i32 = arith.constant 0 : i32
    %c0_i32_0 = arith.constant 0 : i32
    return %arg0, %c0_i32 : i32, i32
  }
}

</mosaic_0001>

<bundles_post_ra>
// kernel: tpu_custom_call.1
= control target key start
LH: loop header
LB: loop body
LE: loop exit
PB: predicated region body
PF: predicated region fallthrough
CT: control target
= control target key end

     0   :  { %6 = vsyncpa [#allocation3], 0  ;;  %s102_s0 = inlined_call_operand.hbm [shape: f32[1,128], index: 0, kind: input, shape index: {}, may-alias: {0,1}]   ;;  %s103_s1 = inlined_call_operand.hbm [shape: f32[1,128], index: 1, kind: output, shape index: {}, may-alias: {0,1}]  }
   0x1   :  { %7 = vsyncpa [#allocation4], 0  ;;  %s84_s6 = smov [#allocation2]  }
   0x2   :  { %s14_s7 = sshll.u32 %s84_s6, 4  ;;  %s15_s7 = int_to_ptr.vmem [resolvable:$true] %s14_s7 }
   0x3   :  { %s48_s8 = scalar_lea.vmem %s15_s7, 16  ;;  %s52_s9 = scalar_lea.vmem %s15_s7, 32 }
   0x4   :  { %p49_p0 = scmp.ne.s32.totalorder %s15_s7, %s48_s8  ;;  %p53_p1 = scmp.lt.s32.totalorder %s15_s7, %s15_s7 }
   0x5   :  { %p54_p2 = scmp.lt.s32.totalorder %s52_s9, %s48_s8 }
   0x7   :  { %p55_p3 = por %p54_p2, %p53_p1 }
   0x9   :  { %p56_p4 = pnand %p55_p3, %p49_p0 }
   0xb   :  { %59 = shalt.err (!%p56_p4)
}
   0xc   :  { %17 = dma.hbm_to_vmem [thread:$0]  %s102_s0, 16, %s15_s7, [#allocation3]  }
   0xd   :  { %80 = dma.done.wait [#allocation3], 16  }
   0xe   :  { %81 = vsyncadd [#allocation3], 4294967280  ;;  %s85_s12 = smov [#allocation5]   ;;  %v21_v0 = vld [vmem:[#allocation2] sm:$0x1] }
   0xf   :  { %s29_s13 = sshll.u32 %s85_s12, 4  ;;  %22 = vst [vmem:[#allocation5] sm:$0x1] %v21_v0  ;;  %s30_s13 = int_to_ptr.vmem [resolvable:$true] %s29_s13 }
  0x10   :  { %s60_s14 = scalar_lea.vmem %s30_s13, 16  ;;  %s64_s15 = scalar_lea.vmem %s30_s13, 32 }
  0x11   :  { %p61_p5 = scmp.ne.s32.totalorder %s30_s13, %s60_s14  ;;  %p65_p6 = scmp.lt.s32.totalorder %s30_s13, %s30_s13 }
  0x12   :  { %p66_p7 = scmp.lt.s32.totalorder %s64_s15, %s60_s14 }
  0x14   :  { %p67_p8 = por %p66_p7, %p65_p6 }
  0x16   :  { %p68_p9 = pnand %p67_p8, %p61_p5 }
  0x18   :  { %71 = shalt.err (!%p68_p9)
}
  0x19   :  { %32 = dma.vmem_to_hbm [thread:$0]  %s30_s13, 16, %s103_s1, [#allocation4]  }
  0x1a   :  { %82 = dma.done.wait [#allocation4], 16  }
  0x1b   :  { %83 = vsyncadd [#allocation4], 4294967280 }
  0x1c   :  { %36 = vsyncpa [#allocation3], 1 }
  0x1d   :  { %37 = vsyncpa [#allocation4], 1 }

</bundles_post_ra>
